<compile_context>
chip_gen: v6e
topology: v6e:2x2x1
jax: 0.10.0
libtpu: 0.0.40
codegen_flags: <defaults>
</compile_context>

<pallas_src>
import jax
import jax.numpy as jnp
from jax.experimental import pallas as pl
from jax.experimental.pallas import tpu as pltpu

_MIB = 1024 * 1024


def _round_up(x, m):
    return ((x + m - 1) // m) * m


def _round16(x):
    return max(16, ((x + 15) // 16) * 16)


def _pad2(a, rows, cols):
    pr, pc = rows - a.shape[0], cols - a.shape[1]
    if pr or pc:
        a = jnp.pad(a, ((0, pr), (0, pc)))
    return a


def _per_core_vmem_budget():
    """Usable per-TensorCore VMEM budget in bytes, with headroom for Mosaic's
    internal scratch / semaphores.  With a 'parallel' grid axis (megacore) the
    budget is per core, not per chip — on v7x that is 64 MiB/TC."""
    try:
        kind = jax.devices()[0].device_kind.lower()
    except Exception:
        kind = ""
    if "v7" in kind:
        return 48 * _MIB                       # 64 MiB per TC minus headroom
    try:
        cap = int(pltpu.get_tpu_info().vmem_capacity_bytes)
        return int(min(cap, 128 * _MIB) * 0.85)
    except Exception:
        return 48 * _MIB                       # conservative, safe on all gens


def _resident_buffer_mode():
    """(BlockSpec kwargs, buffer count) for grid-invariant operands.
    Single-buffering halves their VMEM footprint.  Only a TypeError from the
    BlockSpec constructor (pipeline_mode kwarg unsupported in this jax build)
    triggers the double-buffered fallback; other errors must surface."""
    try:
        pl.BlockSpec((8, 128), lambda i: (0, 0), pipeline_mode=pl.Buffered(1))
        return dict(pipeline_mode=pl.Buffered(1)), 1
    except TypeError:
        return {}, 2


# ----------------------------- kernels --------------------------------------


def _mlp_kernel_resident(x_ref, w1_ref, b1_ref, w2_ref, b2_ref, o_ref):
    """Fused (dropout=id) -> x@W1+b1 -> tanh -> @W2+b2 on one M tile, all in VMEM."""
    x = x_ref[...].astype(w1_ref.dtype)                  # f32 -> bf16 on the VPU
    h = jnp.dot(x, w1_ref[...], preferred_element_type=jnp.float32)
    # TODO(synk): on v6e/v7x an EUP-bound (small In) config could run tanh in
    #             bf16; kept f32 for v5e safety and exact match with reference.
    h = jnp.tanh(h + b1_ref[...])                        # f32 bias + tanh
    out = jnp.dot(h.astype(w2_ref.dtype), w2_ref[...],
                  preferred_element_type=jnp.float32)
    o_ref[...] = (out + b2_ref[...]).astype(o_ref.dtype)  # lane-dense f32 store


def _mlp_kernel_ktiled(x_ref, w1_ref, b1_ref, w2_ref, b2_ref, o_ref, acc_ref):
    """Same math, first contraction (In) split over grid axis 1 with an f32
    VMEM accumulator (init at k==0, finalize at k==last)."""
    k = pl.program_id(1)

    @pl.when(k == 0)
    def _():
        acc_ref[...] = jnp.zeros_like(acc_ref)

    x = x_ref[...].astype(w1_ref.dtype)
    acc_ref[...] += jnp.dot(x, w1_ref[...], preferred_element_type=jnp.float32)

    @pl.when(k == pl.num_programs(1) - 1)
    def _():
        h = jnp.tanh(acc_ref[...] + b1_ref[...])
        out = jnp.dot(h.astype(w2_ref.dtype), w2_ref[...],
                      preferred_element_type=jnp.float32)
        o_ref[...] = (out + b2_ref[...]).astype(o_ref.dtype)


# -------------------------- footprint models --------------------------------


def _resident_footprint(bm, In_p, Hid_p, C_p, wbufs):
    return ((In_p * Hid_p + Hid_p * C_p) * 2 * wbufs     # bf16 weights
            + (Hid_p + C_p) * 4 * wbufs                   # f32 biases
            + 2 * bm * In_p * 4                           # f32 x tiles (2 bufs)
            + 2 * bm * C_p * 4)                           # f32 out tiles (2 bufs)


def _ktiled_footprint(bm, tk, In_p, Hid_p, C_p, wbufs):
    return (2 * tk * Hid_p * 2                            # W1 k-tiles (2 bufs, bf16)
            + Hid_p * C_p * 2 * wbufs                     # resident W2 (bf16)
            + (Hid_p + C_p) * 4 * wbufs                   # f32 biases
            + 2 * bm * tk * 4                             # f32 x tiles (2 bufs)
            + 2 * bm * C_p * 4                            # f32 out tiles (2 bufs)
            + bm * Hid_p * 4)                             # f32 accumulator scratch


# ---------------------------- pallas calls -----------------------------------


def _call_resident(x_p, w1_p, b1_p, w2_p, b2_p, *, bm, vmem_limit, res_kwargs):
    B_p, In_p = x_p.shape
    Hid_p, C_p = w2_p.shape
    grid_m = B_p // bm

    cost = pl.CostEstimate(
        flops=2 * B_p * (In_p * Hid_p + Hid_p * C_p),
        transcendentals=B_p * Hid_p,
        bytes_accessed=(x_p.size * 4 + w1_p.size * 2 + w2_p.size * 2
                        + b1_p.size * 4 + b2_p.size * 4 + B_p * C_p * 4),
    )
    return pl.pallas_call(
        _mlp_kernel_resident,
        out_shape=jax.ShapeDtypeStruct((B_p, C_p), jnp.float32),
        grid_spec=pltpu.PrefetchScalarGridSpec(
            num_scalar_prefetch=0,
            grid=(grid_m,),
            in_specs=[
                pl.BlockSpec((bm, In_p), lambda i: (i, 0)),                 # x tile
                pl.BlockSpec((In_p, Hid_p), lambda i: (0, 0), **res_kwargs),  # W1
                pl.BlockSpec((1, Hid_p), lambda i: (0, 0), **res_kwargs),     # b1
                pl.BlockSpec((Hid_p, C_p), lambda i: (0, 0), **res_kwargs),   # W2
                pl.BlockSpec((1, C_p), lambda i: (0, 0), **res_kwargs),       # b2
            ],
            out_specs=pl.BlockSpec((bm, C_p), lambda i: (i, 0)),
        ),
        compiler_params=pltpu.CompilerParams(
            dimension_semantics=("parallel",),       # M tiles independent -> megacore
            vmem_limit_bytes=int(vmem_limit),
        ),
        cost_estimate=cost,
    )(x_p, w1_p, b1_p, w2_p, b2_p)


def _call_ktiled(x_p, w1_p, b1_p, w2_p, b2_p, *, bm, tk, vmem_limit, res_kwargs):
    B_p, In_p = x_p.shape
    Hid_p, C_p = w2_p.shape
    grid = (B_p // bm, In_p // tk)

    cost = pl.CostEstimate(
        flops=2 * B_p * (In_p * Hid_p + Hid_p * C_p),
        transcendentals=B_p * Hid_p,
        bytes_accessed=(x_p.size * 4 + grid[0] * w1_p.size * 2 + w2_p.size * 2
                        + b1_p.size * 4 + b2_p.size * 4 + B_p * C_p * 4),
    )
    return pl.pallas_call(
        _mlp_kernel_ktiled,
        out_shape=jax.ShapeDtypeStruct((B_p, C_p), jnp.float32),
        grid_spec=pltpu.PrefetchScalarGridSpec(
            num_scalar_prefetch=0,
            grid=grid,
            in_specs=[
                pl.BlockSpec((bm, tk), lambda i, k: (i, k)),                  # x k-tile
                pl.BlockSpec((tk, Hid_p), lambda i, k: (k, 0)),               # W1 k-tile
                pl.BlockSpec((1, Hid_p), lambda i, k: (0, 0), **res_kwargs),  # b1
                pl.BlockSpec((Hid_p, C_p), lambda i, k: (0, 0), **res_kwargs),  # W2
                pl.BlockSpec((1, C_p), lambda i, k: (0, 0), **res_kwargs),    # b2
            ],
            out_specs=pl.BlockSpec((bm, C_p), lambda i, k: (i, 0)),
            scratch_shapes=[pltpu.VMEM((bm, Hid_p), jnp.float32)],
        ),
        compiler_params=pltpu.CompilerParams(
            dimension_semantics=("parallel", "arbitrary"),   # reduction axis last
            vmem_limit_bytes=int(vmem_limit),
        ),
        cost_estimate=cost,
    )(x_p, w1_p, b1_p, w2_p, b2_p)


# ------------------------------- wrapper -------------------------------------


def mlp_forward(x, w1, b1, w2, b2, *, block_m=512, force_path=None):
    """dropout(eval)=identity -> linear1 -> tanh -> linear2.

    x: [B, In] f32; w1: [In, Hid]; b1: [Hid]; w2: [Hid, C]; b2: [C].
    Returns [B, C] f32.  force_path in {None, "resident", "ktiled"} (testing).
    """
    B, In = x.shape
    Hid = w1.shape[1]
    C = w2.shape[1]

    In_p = _round_up(In, 128)
    Hid_p = _round_up(Hid, 128)
    C_p = _round_up(C, 128)

    budget = _per_core_vmem_budget()
    res_kwargs, wbufs = _resident_buffer_mode()

    # M tile: amortize per-step overhead (~0.35 us) but keep >= 8 grid steps
    # (>= 4 per TensorCore on v7x megacore) so the x/out DMAs pipeline.
    bm = min(block_m, _round_up(B, 16))
    while bm > 64 and pl.cdiv(B, bm) < 8:
        bm = _round16(bm // 2)

    # Path selection: keep both layers' weights resident if they fit the
    # per-core budget; otherwise tile the first contraction (In) over the grid.
    resident_w_bytes = (In_p * Hid_p + Hid_p * C_p) * 2 * wbufs
    if force_path is not None:
        use_resident = (force_path == "resident")
    else:
        use_resident = resident_w_bytes <= int(0.65 * budget)

    tk = None
    if use_resident:
        while bm > 16 and _resident_footprint(bm, In_p, Hid_p, C_p, wbufs) > budget:
            bm = _round16(bm // 2)
        footprint = _resident_footprint(bm, In_p, Hid_p, C_p, wbufs)
    else:
        tk = 128
        for cand in (512, 384, 256, 128):          # largest 128-multiple dividing In_p
            if In_p % cand == 0:
                tk = cand
                break
        while bm > 16 and _ktiled_footprint(bm, tk, In_p, Hid_p, C_p, wbufs) > budget:
            bm = _round16(bm // 2)
        footprint = _ktiled_footprint(bm, tk, In_p, Hid_p, C_p, wbufs)
        # TODO(synk): if Hid_p*C_p alone exceeds the per-core budget, an N-tiling
        #             of W2 would also be needed; not required for MLP-head sizes.

    B_p = _round_up(B, bm)
    vmem_limit = footprint + 8 * _MIB              # right-sized, not hard-coded

    # Pad (zeros) only where needed; x stays f32 — the kernel casts to bf16.
    x_p = x.astype(jnp.float32)
    if (B_p, In_p) != (B, In):
        x_p = jnp.pad(x_p, ((0, B_p - B), (0, In_p - In)))

    bf16 = jnp.bfloat16
    w1_p = _pad2(w1, In_p, Hid_p).astype(bf16)
    w2_p = _pad2(w2, Hid_p, C_p).astype(bf16)
    b1_p = _pad2(b1.reshape(1, -1).astype(jnp.float32), 1, Hid_p)
    b2_p = _pad2(b2.reshape(1, -1).astype(jnp.float32), 1, C_p)

    if use_resident:
        out_p = _call_resident(x_p, w1_p, b1_p, w2_p, b2_p,
                               bm=bm, vmem_limit=vmem_limit, res_kwargs=res_kwargs)
    else:
        out_p = _call_ktiled(x_p, w1_p, b1_p, w2_p, b2_p,
                             bm=bm, tk=tk, vmem_limit=vmem_limit, res_kwargs=res_kwargs)

    return out_p[:B, :C]


# ------------------------------ reference ------------------------------------


def _ref_forward(x, w1, b1, w2, b2):
    """Pure-JAX reference with matching arithmetic (bf16 matmul inputs, f32
    accumulation / bias / tanh); dropout = identity in eval mode."""
    xb = x.astype(jnp.bfloat16)
    h = jnp.tanh(jnp.dot(xb, w1.astype(jnp.bfloat16),
                         preferred_element_type=jnp.float32) + b1)
    return jnp.dot(h.astype(jnp.bfloat16), w2.astype(jnp.bfloat16),
                   preferred_element_type=jnp.float32) + b2


def init_linear_params(kw, kb, fan_in, fan_out, dtype=jnp.float32):
    """PyTorch nn.Linear default init: U(-1/sqrt(fan_in), 1/sqrt(fan_in)).
    Weight returned already transposed to [fan_in, fan_out]."""
    bound = 1.0 / (fan_in ** 0.5)
    w = jax.random.uniform(kw, (fan_in, fan_out), dtype, -bound, bound)
    b = jax.random.uniform(kb, (fan_out,), dtype, -bound, bound)
    return w, b


if __name__ == "__main__":
    # --- Test 1: auto path (resident weights). Exercises M tiling (bm=64,
    # grid=8 -> 4 steps/TC on v7x), batch padding (500->512) and feature
    # padding (100->128, 200->256, 10->128 lane-dense output). ---
    batch, input_size, output_size, num_class = 500, 100, 200, 10
    kx, k1w, k1b, k2w, k2b = jax.random.split(jax.random.PRNGKey(0), 5)
    x = jax.random.normal(kx, (batch, input_size), jnp.float32)
    w1, b1 = init_linear_params(k1w, k1b, input_size, output_size)
    w2, b2 = init_linear_params(k2w, k2b, output_size, num_class)

    out = jax.block_until_ready(mlp_forward(x, w1, b1, w2, b2))
    ref = _ref_forward(x, w1, b1, w2, b2)
    assert out.shape == (batch, num_class)
    assert jnp.allclose(out, ref, atol=5e-3, rtol=5e-3), \
        float(jnp.max(jnp.abs(out - ref)))

    # --- Test 2: force the K-tiled accumulator path (the large-weight fallback
    # used when resident weights exceed the per-TensorCore VMEM budget). ---
    batch2, in2, hid2, nc2 = 200, 1000, 96, 12       # In_p=1024, tk=512, grid_k=2
    kx2, k3w, k3b, k4w, k4b = jax.random.split(jax.random.PRNGKey(1), 5)
    x2 = jax.random.normal(kx2, (batch2, in2), jnp.float32)
    w3, b3 = init_linear_params(k3w, k3b, in2, hid2)
    w4, b4 = init_linear_params(k4w, k4b, hid2, nc2)

    out2 = jax.block_until_ready(
        mlp_forward(x2, w3, b3, w4, b4, force_path="ktiled"))
    ref2 = _ref_forward(x2, w3, b3, w4, b4)
    assert out2.shape == (batch2, nc2)
    assert jnp.allclose(out2, ref2, atol=5e-3, rtol=5e-3), \
        float(jnp.max(jnp.abs(out2 - ref2)))

    print("KERNEL_OK")
</pallas_src>

<mosaic_0001>
module attributes {stable_mosaic.version = 11 : i64} {
  func.func @_mlp_kernel_resident(%arg0: i32, %arg1: memref<64x128xf32, #tpu.memory_space<vmem>>, %arg2: memref<128x256xbf16, #tpu.memory_space<vmem>>, %arg3: memref<1x256xf32, #tpu.memory_space<vmem>>, %arg4: memref<256x128xbf16, #tpu.memory_space<vmem>>, %arg5: memref<1x128xf32, #tpu.memory_space<vmem>>, %arg6: memref<64x128xf32, #tpu.memory_space<vmem>>) attributes {dimension_semantics = [#tpu.dimension_semantics<parallel>], iteration_bounds = array<i64: 8>, scalar_prefetch = 0 : i64, scratch_operands = 0 : i64, tpu.core_type = #tpu.core_type<tc>, window_params = [{transform_indices = @transform_0, window_bounds = array<i64: 64, 128>}, {pipeline_mode = #tpu.pipeline_mode<synchronous>, transform_indices = @transform_1, window_bounds = array<i64: 128, 256>}, {pipeline_mode = #tpu.pipeline_mode<synchronous>, transform_indices = @transform_2, window_bounds = array<i64: 1, 256>}, {pipeline_mode = #tpu.pipeline_mode<synchronous>, transform_indices = @transform_3, window_bounds = array<i64: 256, 128>}, {pipeline_mode = #tpu.pipeline_mode<synchronous>, transform_indices = @transform_4, window_bounds = array<i64: 1, 128>}, {transform_indices = @transform_5, window_bounds = array<i64: 64, 128>}]} {
    %c0 = arith.constant 0 : index
    %c0_0 = arith.constant 0 : index
    %0 = vector.load %arg1[%c0, %c0_0] : memref<64x128xf32, #tpu.memory_space<vmem>>, vector<64x128xf32>
    %1 = arith.truncf %0 : vector<64x128xf32> to vector<64x128xbf16>
    %c0_1 = arith.constant 0 : index
    %c0_2 = arith.constant 0 : index
    %2 = vector.load %arg2[%c0_1, %c0_2] : memref<128x256xbf16, #tpu.memory_space<vmem>>, vector<128x256xbf16>
    %cst = arith.constant dense<0.000000e+00> : vector<64x256xf32>
    %3 = tpu.matmul %1, %2, %cst {dimension_numbers = #tpu.dot_dimension_numbers<[1], [0], [0], [1], [0, 0, 1, 1], [], []>} : vector<64x128xbf16>, vector<128x256xbf16>, vector<64x256xf32> -> vector<64x256xf32>
    %c0_3 = arith.constant 0 : index
    %c0_4 = arith.constant 0 : index
    %4 = vector.load %arg3[%c0_3, %c0_4] : memref<1x256xf32, #tpu.memory_space<vmem>>, vector<1x256xf32>
    %5 = vector.broadcast %4 : vector<1x256xf32> to vector<64x256xf32>
    %6 = arith.addf %3, %5 : vector<64x256xf32>
    %7 = math.tanh %6 : vector<64x256xf32>
    %8 = arith.truncf %7 : vector<64x256xf32> to vector<64x256xbf16>
    %c0_5 = arith.constant 0 : index
    %c0_6 = arith.constant 0 : index
    %9 = vector.load %arg4[%c0_5, %c0_6] : memref<256x128xbf16, #tpu.memory_space<vmem>>, vector<256x128xbf16>
    %cst_7 = arith.constant dense<0.000000e+00> : vector<64x128xf32>
    %10 = tpu.matmul %8, %9, %cst_7 {dimension_numbers = #tpu.dot_dimension_numbers<[1], [0], [0], [1], [0, 0, 1, 1], [], []>} : vector<64x256xbf16>, vector<256x128xbf16>, vector<64x128xf32> -> vector<64x128xf32>
    %c0_8 = arith.constant 0 : index
    %c0_9 = arith.constant 0 : index
    %11 = vector.load %arg5[%c0_8, %c0_9] : memref<1x128xf32, #tpu.memory_space<vmem>>, vector<1x128xf32>
    %12 = vector.broadcast %11 : vector<1x128xf32> to vector<64x128xf32>
    %13 = arith.addf %10, %12 : vector<64x128xf32>
    %c0_10 = arith.constant 0 : index
    %c0_11 = arith.constant 0 : index
    %14 = vector.load %arg6[%c0_10, %c0_11] : memref<64x128xf32, #tpu.memory_space<vmem>>, vector<64x128xf32>
    tpu.vector_store %arg6[%c0_10, %c0_11], %13 {strides = array<i32>} : memref<64x128xf32, #tpu.memory_space<vmem>>, vector<64x128xf32>,
    return
  }
  func.func @transform_0(%arg0: i32) -> (i32, i32) {
    %c0_i32 = arith.constant 0 : i32
    %c0_i32_0 = arith.constant 0 : i32
    return %arg0, %c0_i32 : i32, i32
  }
  func.func @transform_1(%arg0: i32) -> (i32, i32) {
    %c0_i32 = arith.constant 0 : i32
    %c0_i32_0 = arith.constant 0 : i32
    %c0_i32_1 = arith.constant 0 : i32
    return %c0_i32, %c0_i32_0 : i32, i32
  }
  func.func @transform_2(%arg0: i32) -> (i32, i32) {
    %c0_i32 = arith.constant 0 : i32
    %c0_i32_0 = arith.constant 0 : i32
    %c0_i32_1 = arith.constant 0 : i32
    return %c0_i32, %c0_i32_0 : i32, i32
  }
  func.func @transform_3(%arg0: i32) -> (i32, i32) {
    %c0_i32 = arith.constant 0 : i32
    %c0_i32_0 = arith.constant 0 : i32
    %c0_i32_1 = arith.constant 0 : i32
    return %c0_i32, %c0_i32_0 : i32, i32
  }
  func.func @transform_4(%arg0: i32) -> (i32, i32) {
    %c0_i32 = arith.constant 0 : i32
    %c0_i32_0 = arith.constant 0 : i32
    %c0_i32_1 = arith.constant 0 : i32
    return %c0_i32, %c0_i32_0 : i32, i32
  }
  func.func @transform_5(%arg0: i32) -> (i32, i32) {
    %c0_i32 = arith.constant 0 : i32
    %c0_i32_0 = arith.constant 0 : i32
    return %arg0, %c0_i32 : i32, i32
  }
}

</mosaic_0001>

<bundles_post_ra>
// kernel: tpu_custom_call.1
= control target key start
LH: loop header
LB: loop body
LE: loop exit
PB: predicated region body
PF: predicated region fallthrough
CT: control target
= control target key end

     0   :  { %10 = vsyncpa [#allocation3], 0  ;;  %s1459_s0 = inlined_call_operand.hbm [shape: f32[512,128], index: 0, kind: input, shape index: {}]   ;;  %s1460_s1 = inlined_call_operand.hbm [shape: bf16[128,256], index: 1, kind: input, shape index: {}]   ;;  %s1461_s2 = inlined_call_operand.vmem [shape: f32[1,256], index: 2, kind: input, shape index: {}]   ;;  %s1462_s3 = inlined_call_operand.hbm [shape: bf16[256,128], index: 3, kind: input, shape index: {}]   ;;  %s1463_s4 = inlined_call_operand.vmem [shape: f32[1,128], index: 4, kind: input, shape index: {}]   ;;  %s1464_s5 = inlined_call_operand.hbm [shape: f32[512,128], index: 5, kind: output, shape index: {}]  }
   0x1   :  { %12 = vsyncpa [#allocation3 + $0x1], 0 }
   0x2   :  { %13 = vsyncpa [#allocation6], 0 }
   0x3   :  { %14 = vsyncpa [#allocation4], 0 }
   0x4   :  { %16 = vsyncpa [#allocation4 + $0x1], 0  ;;  %s1236_s18 = smov 0   ;;  %s1238_s19 = smov 0  }
   0x5   :  { %s1240_s20 = smov 0   ;;  %s1242_s21 = smov 0  }
   0x6 LB: > { %s1257_s22 = sadd.s32 4294967295, %s1193_s21   ;;  %s806_s23 = sadd.s32 4294967294, %s1193_s21   ;;  %s1193_s21 = sphi %s1242_s21, %s1486_s21   ;;  %s1189_s20 = sphi %s1240_s20, %s1485_s20   ;;  %s1185_s19 = sphi %s1238_s19, %s1484_s19   ;;  %s1181_s18 = sphi %s1236_s18, %s1483_s18  }
   0x7   : > { %p42_p0 = scmp.ne.s32.totalorder %s1185_s19, %s1181_s18  ;;  %p1465_p1 = scmp.eq.s32.totalorder %s1257_s22, 0 }
   0x8   : > { %p150_p2 = scmp.eq.s32.totalorder %s1257_s22, 7  ;;  %p156_p3 = scmp.eq.s32.totalorder %s806_s23, 7 }
   0x9   : > { %p1266_p4 = por %p1465_p1, %p42_p0  ;;  %p807_p5 = scmp.ge.s32.totalorder %s1193_s21, 1 }
   0xa   : > { %p1271_p6 = por %p156_p3, %p42_p0  ;;  %p163_p7 = scmp.lt.s32.totalorder %s1193_s21, 9 }
   0xb   : > { %s1470_s24 = scalar_select %p1266_p4, 1, 0 }
   0xc   : > { %s1471_s25 = scalar_select %p1271_p6, 1, 0 }
   0xd   : > { %p1276_p8 = pnand %p807_p5, %p163_p7  ;;  %s1195_s27 = smov [#allocation5]  }
   0xe   : > { %s175_s28 = sshll.u32 %s1195_s27, 4  ;;  %s1196_s30 = smov [#allocation7]   ;;  %s176_s28 = int_to_ptr.vmem [resolvable:$true] %s175_s28 }
   0xf   : > { %s1472_s26 = scalar_select %p1276_p8, 1, 0 }
  0x10   : > { %p911_p9 = pneg %p1276_p8  ;;  %s191_s6 = sshll.u32 %s1196_s30, 4  ;;  %s192_s6 = int_to_ptr.vmem [resolvable:$true] %s191_s6 }
  0x11   : > { %s1056_s7 = scalar_lea.vmem %s176_s28, 2048  ;;  %p1064_p3 = scmp.lt.s32.totalorder %s176_s28, %s176_s28 }
  0x12   : > { %p1284_p10 = pnand %p911_p9, %p1465_p1  ;;  %p1057_p12 = scmp.ne.s32.totalorder %s176_s28, %s1056_s7 }
  0x13   : > { %p1065_p5 = scmp.lt.s32.totalorder %s1056_s7, %s1056_s7 }
  0x14   : > { %p1047_p11 = pneg %p1284_p10 }
  0x15   : > { %p1066_p7 = por %p1065_p5, %p1064_p3 }
  0x16   : > { %p1059_p13 = pnand %p1057_p12, %p1047_p11 }
  0x18   : > { %p1060_p0 = pneg %p1059_p13 }
  0x1a   : > { %p1067_p9 = pnand %p1066_p7, %p1060_p0 }
  0x1c   : > { %1070 = shalt.err (!%p1067_p9)
}
  0x1d   : > { %s1466_s8 = smov 128   ;;  %s1198_s9 = smov 8  }
  0x1e   : > { %914 = dma.hbm_to_vmem [thread:$0]  (!%p1284_p10), %s1460_s1, 2048, %s176_s28, [#allocation6], %s1466_s8, %s1466_s8, %s1198_s9  }
  0x1f   : > { %s1082_s12 = scalar_lea.vmem %s192_s6, 2048  ;;  %p1090_p0 = scmp.lt.s32.totalorder %s192_s6, %s192_s6 }
  0x20   : > { %p1083_p12 = scmp.ne.s32.totalorder %s192_s6, %s1082_s12  ;;  %p1091_p5 = scmp.lt.s32.totalorder %s1082_s12, %s1082_s12 }
  0x22   : > { %p1085_p13 = pnand %p1083_p12, %p1047_p11  ;;  %p1092_p7 = por %p1091_p5, %p1090_p0 }
  0x24   : > { %p1086_p3 = pneg %p1085_p13 }
  0x26   : > { %p1093_p9 = pnand %p1092_p7, %p1086_p3 }
  0x28   : > { %1096 = shalt.err (!%p1093_p9)
}
  0x29   : > { %s1199_s13 = smov 64   ;;  %s1200_s14 = smov 4  }
  0x2a   : > { %917 = dma.hbm_to_vmem [thread:$0]  (!%p1284_p10), %s1462_s3, 2048, %s192_s6, [#allocation6], %s1199_s13, %s1199_s13, %s1200_s14  }
  0x2b   : > { %s1310_s17 = sadd.s32 1, %s1193_s21   ;;  %s29_s27 = sadd.s32 1, %s1189_s20 }
  0x2c   : > { %s26_s23 = ssub.s32 %s1193_s21, %s1310_s17  ;;  %p36_p12 = scmp.ne.s32.totalorder %s1189_s20, %s1185_s19 }
  0x2d   : > { %p27_p11 = scmp.eq.s32.totalorder %s26_s23, 0  ;;  %p37_p13 = scmp.eq.s32.totalorder %s1193_s21, 0 }
  0x2e   : > { %p1323_p0 = por %p150_p2, %p36_p12  ;;  %p928_p5 = scmp.lt.s32.totalorder %s1193_s21, 8 }
  0x2f   : > { %s1319_s28 = scalar_select %p27_p11, %s1189_s20, %s29_s27  }
  0x30   : > { %p38_p3 = por %p37_p13, %p36_p12  ;;  %s208_s29 = sand.u32 1, %s1189_s20  }
  0x31   : > { %s1474_s30 = scalar_select %p1323_p0, 1, 0 }
  0x32   : > { %s811_s7 = sshll.u32 %s208_s29, 6  ;;  %s857_s6 = sshll.u32 %s1193_s21, 10 }
  0x33   : > { %s1333_s12 = scalar_lea.hbm %s1459_s0, %s857_s6  ;;  %s212_s13 = scalar_lea.vmem [#allocation2], %s811_s7 }
  0x34   : > { %s219_s14 = sshll.u32 %s212_s13, 4  ;;  %p1337_p2 = pnand %p928_p5, %p38_p3  ;;  %s1335_s14 = int_to_ptr.vmem [resolvable:$true] %s219_s14 }
  0x35   : > { %s1341_s16 = scalar_lea.sflag [#allocation3], %s208_s29  ;;  %s1097_s23 = scalar_lea.hbm %s1333_s12, 1024 }
  0x36   : > { %p1098_p10 = scmp.ne.s32.totalorder %s1333_s12, %s1097_s23  ;;  %p1099_p7 = pneg %p1337_p2 }
  0x37   : > { %s1102_s7 = scalar_lea.hbm %s1459_s0, 8192  ;;  %p1103_p12 = scmp.lt.s32.totalorder %s1333_s12, %s1459_s0 }
  0x38   : > { %p1100_p9 = pnand %p1099_p7, %p1098_p10  ;;  %p1104_p13 = scmp.lt.s32.totalorder %s1102_s7, %s1097_s23 }
  0x3a   : > { %p1101_p11 = pneg %p1100_p9  ;;  %p1105_p3 = por %p1104_p13, %p1103_p12 }
  0x3c   : > { %p1106_p5 = pnand %p1105_p3, %p1101_p11 }
  0x3e   : > { %1109 = shalt.err (!%p1106_p5)
}
  0x3f   : > { %s1110_s29 = scalar_lea.vmem %s1335_s14, 1024  ;;  %s1201_s13 = smov [#allocation2]  }
  0x40   : > { %p1111_p1 = scmp.ne.s32.totalorder %s1335_s14, %s1110_s29  ;;  %s1115_s8 = sshll.u32 %s1201_s13, 4  ;;  %s1116_s8 = int_to_ptr.vmem [resolvable:$false] %s1115_s8 }
  0x41   : > { %s1117_s27 = scalar_lea.vmem %s1116_s8, 2048  ;;  %p1118_p9 = scmp.lt.s32.totalorder %s1335_s14, %s1116_s8 }
  0x42   : > { %p1113_p6 = pnand %p1111_p1, %p1099_p7  ;;  %p1119_p0 = scmp.lt.s32.totalorder %s1117_s27, %s1110_s29 }
  0x44   : > { %p1114_p10 = pneg %p1113_p6  ;;  %p1120_p4 = por %p1119_p0, %p1118_p9 }
  0x46   : > { %p1121_p8 = pnand %p1120_p4, %p1114_p10 }
  0x48   : > { %1124 = shalt.err (!%p1121_p8)
}
  0x49   : > { %s1476_s23 = smov 128   ;;  %p1477_p1 = scmp.ne.s32.totalorder %s1472_s26, 0 }
  0x4a   : > { %921 = dma.hbm_to_vmem [thread:$0]  (!%p1337_p2), %s1333_s12, 1024, %s1335_s14, %s1341_s16, %s1476_s23, %s1476_s23, %s1198_s9  }
  0x4b   : > { %231 = sbr.rel (%p1477_p1) target bundleno = 576 (0x240), region = 40  ;;  %s1368_s6 = sand.u32 (!%p1477_p1), 1, %s1185_s19  }
  0x4c   : > { %s815_s8 = sshll.u32 (!%p1477_p1), %s1368_s6, 6  ;;  %s234_s7 = scalar_lea.sflag (!%p1477_p1), [#allocation3], %s1368_s6 }
  0x4d   : > { %s1374_s15 = scalar_lea.vmem (!%p1477_p1), [#allocation2], %s815_s8  ;;  %p1478_p4 = scmp.ne.s32.totalorder (!%p1477_p1), %s1470_s24, 0 }
  0x50   : > { %1168 = dma.done.wait (%p1478_p4), %s234_s7, 1024  }
  0x51   : > { %1170 = vsyncadd (%p1478_p4), %s234_s7, 4294966272  ;;  %p1479_p6 = scmp.eq.s32.totalorder %s1257_s22, 0 }
  0x53   : > { %1172 = dma.done.wait (%p1479_p6), [#allocation6], 4096   ;;  %p1480_p8 = pmov %p1479_p6 }
  0x54   : > { %v1202_v0 = vmov 0   ;;  %v973_v1 = vld [vmem:[#allocation5 + $0x74] ss:$8 sps:$4 sm:$0xff]   ;;  %v975_v2 = vld [vmem:[#allocation5 + $0x70] ss:$8 sps:$4 sm:$0xff]   ;;  %v275_v21 = vld [vmem:[%s1374_s15] sm:$0xff]  ;;  %v305_v45 = vlaneseq }
  0x55   : > { %1174 = vsyncadd (%p1480_p8), [#allocation6], 4294963200  ;;  %427 = vmatprep.mubr.bf16.mxu0 %v1202_v0  ;;  %395 = vmatprep.subr.bf16.mxu0 %v973_v1  ;;  %v976_v3 = vld [vmem:[#allocation5 + $0x64] ss:$8 sps:$4 sm:$0xff]   ;;  %v978_v4 = vld [vmem:[#allocation5 + $0x60] ss:$8 sps:$4 sm:$0xff]  }
  0x56   : > { %396 = vmatpush1.bf16.msra.mxu0 %v975_v2  ;;  %v979_v5 = vld [vmem:[#allocation5 + $0x54] ss:$8 sps:$4 sm:$0xff]   ;;  %v981_v6 = vld [vmem:[#allocation5 + $0x50] ss:$8 sps:$4 sm:$0xff]   ;;  %v982_v7 = vld [vmem:[#allocation5 + $0x44] ss:$8 sps:$4 sm:$0xff]  }
  0x57   : > { %397 = vmatprep.subr.bf16.mxu0 %v976_v3  ;;  %v984_v8 = vld [vmem:[#allocation5 + $0x40] ss:$8 sps:$4 sm:$0xff]   ;;  %v985_v9 = vld [vmem:[#allocation5 + $0x34] ss:$8 sps:$4 sm:$0xff]   ;;  %v987_v10 = vld [vmem:[#allocation5 + $0x30] ss:$8 sps:$4 sm:$0xff]  }
  0x58   : > { %v988_v11 = vld [vmem:[#allocation5 + $0x24] ss:$8 sps:$4 sm:$0xff]   ;;  %v997_v12 = vld [vmem:[#allocation7 + $0x78] sm:$0xff]   ;;  %v999_v14 = vld [vmem:[#allocation7 + $0x70] sm:$0xff]   ;;  %v306_v46 = vshrl.u32 %v305_v45, 7  ;;  %s1400_s14 = scalar_lea.vmem [#allocation8], %s815_s8 }
  0x59   : > { %v998_v13 = vld [vmem:[#allocation7 + $0x38] sm:$0xff]   ;;  %859 = vmatprep.subr.bf16.mxu1 %v997_v12  ;;  %v990_v15 = vld [vmem:[#allocation5 + $0x20] ss:$8 sps:$4 sm:$0xff]   ;;  %v1000_v16 = vld [vmem:[#allocation7 + $0x30] sm:$0xff]   ;;  %s714_s16 = sshll.u32 %s1400_s14, 4  ;;  %s858_s10 = sshll.u32 %s1257_s22, 10  ;;  %s1410_s16 = int_to_ptr.vmem [resolvable:$true] %s714_s16 }
  0x5a   : > { %398 = vmatpush1.bf16.msra.mxu0 %v978_v4  ;;  %860 = vmatpush3.bf16.msra.mxu1 %v998_v13  ;;  %v991_v17 = vld [vmem:[#allocation5 + $0x14] ss:$8 sps:$4 sm:$0xff]   ;;  %v993_v18 = vld [vmem:[#allocation5 + $0x10] ss:$8 sps:$4 sm:$0xff]   ;;  %v994_v19 = vld [vmem:[#allocation5 + $0x4] ss:$8 sps:$4 sm:$0xff]   ;;  %s1416_s13 = scalar_lea.hbm %s1464_s5, %s858_s10 }
  0x5b   : > { %399 = vmatprep.subr.bf16.mxu0 %v979_v5  ;;  %861 = vmatprep.subr.bf16.mxu1 %v999_v14  ;;  %v996_v20 = vld [vmem:[#allocation5] ss:$8 sps:$4 sm:$0xff]   ;;  %v277_v24 = vld [vmem:[%s1374_s15 + $0x10] sm:$0xff]  ;;  %v278_v25 = vld [vmem:[%s1374_s15 + $0x18] sm:$0xff]  ;;  %v311_v47 = vsub.s32 1, %v306_v46  ;;  %v307_v49 = vsub.s32 0, %v306_v46 }
  0x5c   : > { %v276_v22 = vld [vmem:[%s1374_s15 + $0x8] sm:$0xff]  ;;  %v284_v26 = vpack.c.bf16 %v278_v25, %v277_v24  ;;  %v279_v27 = vld [vmem:[%s1374_s15 + $0x20] sm:$0xff]  ;;  %v281_v30 = vld [vmem:[%s1374_s15 + $0x30] sm:$0xff]  ;;  %s701_s27 = scalar_lea.sflag [#allocation4], %s1368_s6  ;;  %s1125_s23 = scalar_lea.vmem %s1410_s16, 1024 }
  0x5d   : > { %v283_v23 = vpack.c.bf16 %v276_v22, %v275_v21  ;;  %v280_v28 = vld [vmem:[%s1374_s15 + $0x28] sm:$0xff]  ;;  %v282_v31 = vld [vmem:[%s1374_s15 + $0x38] sm:$0xff]  ;;  %v1003_v35 = vld [vmem:[#allocation7 + $0x60] sm:$0xff]   ;;  %p1126_p0 = scmp.ne.s32.totalorder %s1410_s16, %s1125_s23  ;;  %p1481_p2 = scmp.ne.s32.totalorder %s1474_s30, 0 }
  0x5e   : > { %400 = vmatpush1.bf16.msra.mxu0 %v981_v6  ;;  %862 = vmatpush3.bf16.msra.mxu1 %v1000_v16  ;;  %v285_v29 = vpack.c.bf16 %v280_v28, %v279_v27  ;;  %v286_v32 = vpack.c.bf16 %v282_v31, %v281_v30  ;;  %v1001_v33 = vld [vmem:[#allocation7 + $0x68] sm:$0xff]   ;;  %v1004_v36 = vld [vmem:[#allocation7 + $0x20] sm:$0xff]   ;;  %v1005_v37 = vld [vmem:[#allocation7 + $0x58] sm:$0xff]   ;;  %s1203_s22 = smov [#allocation8]  }
  0x5f   : > { %401 = vmatprep.subr.bf16.mxu0 %v982_v7  ;;  %v1002_v34 = vld [vmem:[#allocation7 + $0x28] sm:$0xff]   ;;  %863 = vmatprep.subr.bf16.mxu1 %v1001_v33  ;;  %v1006_v38 = vld [vmem:[#allocation7 + $0x18] sm:$0xff]   ;;  %v1007_v39 = vld [vmem:[#allocation7 + $0x50] sm:$0xff]   ;;  %p1127_p7 = pnand %p1126_p0, %p1481_p2  ;;  %s1129_s8 = sshll.u32 %s1203_s22, 4  ;;  %s1130_s8 = int_to_ptr.vmem [resolvable:$false] %s1129_s8 }
  0x60   : > { %v1008_v40 = vld [vmem:[#allocation7 + $0x10] sm:$0xff]   ;;  %v1009_v41 = vld [vmem:[#allocation7 + $0x48] sm:$0xff]   ;;  %v1011_v43 = vld [vmem:[#allocation7 + $0x40] sm:$0xff]   ;;  %s1131_s7 = scalar_lea.vmem %s1130_s8, 2048  ;;  %p1132_p12 = scmp.lt.s32.totalorder %s1410_s16, %s1130_s8 }
  0x61   : > { %v1010_v42 = vld [vmem:[#allocation7 + $0x8] sm:$0xff]   ;;  %v1012_v44 = vld [vmem:[#allocation7] sm:$0xff]   ;;  %p1128_p11 = pneg %p1127_p7  ;;  %p1133_p13 = scmp.lt.s32.totalorder %s1131_s7, %s1125_s23 }
  0x62   : > { %402 = vmatpush1.bf16.msra.mxu0 %v984_v8  ;;  %864 = vmatpush3.bf16.msra.mxu1 %v1002_v34  ;;  %v303_v48 = vld [vmem:[%s1461_s2] sm:$0x3] }
  0x63   : > { %403 = vmatprep.subr.bf16.mxu0 %v985_v9  ;;  %865 = vmatprep.subr.bf16.mxu1 %v1003_v35  ;;  %v312_v50 = vrot.slane %v303_v48, %v311_v47  ;;  %v308_v52 = vrot.slane %v303_v48, %v307_v49  ;;  %v835_v45 = vld [vmem:[%s1463_s4] ss:$0 sm:$0xff]  ;;  %p1134_p3 = por %p1133_p13, %p1132_p12 }
  0x65   : > { %p1135_p5 = pnand %p1134_p3, %p1128_p11 }
  0x66   : > { %404 = vmatpush1.bf16.msra.mxu0 %v987_v10  ;;  %866 = vmatpush3.bf16.msra.mxu1 %v1004_v36 }
  0x67   : > { %405 = vmatprep.subr.bf16.mxu0 %v988_v11  ;;  %867 = vmatprep.subr.bf16.mxu1 %v1005_v37 }
  0x6a   : > { %406 = vmatpush1.bf16.msra.mxu0 %v990_v15  ;;  %868 = vmatpush3.bf16.msra.mxu1 %v1006_v38 }
  0x6b   : > { %407 = vmatprep.subr.bf16.mxu0 %v991_v17  ;;  %869 = vmatprep.subr.bf16.mxu1 %v1007_v39 }
  0x6e   : > { %408 = vmatpush1.bf16.msra.mxu0 %v993_v18  ;;  %870 = vmatpush3.bf16.msra.mxu1 %v1008_v40 }
  0x6f   : > { %409 = vmatprep.subr.bf16.mxu0 %v994_v19  ;;  %871 = vmatprep.subr.bf16.mxu1 %v1009_v41 }
  0x72   : > { %410 = vmatpush1.bf16.msra.mxu0 %v996_v20  ;;  %872 = vmatpush3.bf16.msra.mxu1 %v1010_v42 }
  0x73   : > { %873 = vmatprep.subr.bf16.mxu1 %v1011_v43 }
  0x75   : > { %428 = vmatmul.mubr.bf16.vlgmr.msra.gmra.mxu0 %v283_v23 }
  0x76   : > { %437 = vmatprep.mubr.bf16.mxu0 %v1202_v0  ;;  %874 = vmatpush3.bf16.msra.mxu1 %v1012_v44 }
  0x7d   : > { %438 = vmatmul.mubr.bf16.gmra.mxu0 %v284_v26 }
  0x7e   : > { %447 = vmatprep.mubr.bf16.mxu0 %v1202_v0 }
  0x85   : > { %448 = vmatmul.mubr.bf16.gmra.mxu0 %v285_v29 }
  0x86   : > { %457 = vmatprep.mubr.bf16.mxu0 %v1202_v0 }
  0x8d   : > { %458 = vmatmul.mubr.bf16.gmra.mxu0 %v286_v32 }
 0x135   : > { %v429_v51 = vpop.f32.mrf.mxu0 }
 0x136   : > { %v430_v57 = vadd.f32 %v429_v51, %v308_v52 }
 0x137   : > { %v431_v53 = vpop.f32.mrf.mxu0 }
 0x138   : > { %v432_v54 = vadd.f32 %v431_v53, %v312_v50 }
 0x139   : > { %v433_v55 = vpop.f32.mrf.mxu0 }
 0x13a   : > { %v434_v56 = vadd.f32 %v433_v55, %v308_v52  ;;  %1013 = vtanh.f32 %v432_v54 }
 0x13b   : > { %v435_v58 = vpop.f32.mrf.mxu0 }
 0x13c   : > { %v436_v59 = vadd.f32 %v435_v58, %v312_v50  ;;  %1015 = vtanh.f32 %v434_v56 }
 0x13d   : > { %v439_v60 = vpop.f32.mrf.mxu0 }
 0x13e   : > { %1017 = vtanh.f32 %v436_v59  ;;  %v440_v1 = vadd.f32 %v439_v60, %v308_v52 }
 0x13f   : > { %1019 = vtanh.f32 %v430_v57  ;;  %v441_v61 = vpop.f32.mrf.mxu0 }
 0x140   : > { %v442_v62 = vadd.f32 %v441_v61, %v312_v50 }
 0x141   : > { %v443_v63 = vpop.f32.mrf.mxu0 }
 0x142   : > { %v444_v0 = vadd.f32 %v443_v63, %v308_v52  ;;  %1021 = vtanh.f32 %v442_v62 }
 0x143   : > { %v445_v2 = vpop.f32.mrf.mxu0 }
 0x144   : > { %v446_v3 = vadd.f32 %v445_v2, %v312_v50  ;;  %1023 = vtanh.f32 %v444_v0 }
 0x145   : > { %v449_v4 = vpop.f32.mrf.mxu0 }
 0x146   : > { %1025 = vtanh.f32 %v446_v3  ;;  %v450_v12 = vadd.f32 %v449_v4, %v308_v52 }
 0x147   : > { %1027 = vtanh.f32 %v440_v1  ;;  %v451_v5 = vpop.f32.mrf.mxu0  ;;  %v1014_v7 = vpop.eup %1013 }
 0x148   : > { %v452_v6 = vadd.f32 %v451_v5, %v312_v50 }
 0x149   : > { %v453_v8 = vpop.f32.mrf.mxu0  ;;  %v1016_v9 = vpop.eup %1015 }
 0x14a   : > { %v454_v10 = vadd.f32 %v453_v8, %v308_v52  ;;  %1029 = vtanh.f32 %v452_v6 }
 0x14b   : > { %v1018_v11 = vpop.eup %1017  ;;  %v455_v13 = vpop.f32.mrf.mxu0 }
 0x14c   : > { %v1020_v14 = vpop.eup %1019  ;;  %v456_v15 = vadd.f32 %v455_v13, %v312_v50  ;;  %v485_v16 = vpack.c.bf16 %v1018_v11, %v1014_v7  ;;  %1031 = vtanh.f32 %v454_v10 }
 0x14d   : > { %v459_v17 = vpop.f32.mrf.mxu0  ;;  %v484_v18 = vpack.c.bf16 %v1016_v9, %v1020_v14 }
 0x14e   : > { %1033 = vtanh.f32 %v456_v15  ;;  %659 = vmatprep.mubr.bf16.mxu1 %v485_v16  ;;  %v460_v26 = vadd.f32 %v459_v17, %v308_v52 }
 0x14f   : > { %1035 = vtanh.f32 %v450_v12  ;;  %v461_v19 = vpop.f32.mrf.mxu0  ;;  %660 = vmatmul.mubr.bf16.vlgmr.msra.gmra.mxu1 %v484_v18  ;;  %v1022_v21 = vpop.eup %1021 }
 0x150   : > { %v462_v20 = vadd.f32 %v461_v19, %v312_v50 }
 0x151   : > { %v463_v22 = vpop.f32.mrf.mxu0  ;;  %v1024_v23 = vpop.eup %1023 }
 0x152   : > { %v464_v24 = vadd.f32 %v463_v22, %v308_v52  ;;  %1037 = vtanh.f32 %v462_v20 }
 0x153   : > { %v1026_v25 = vpop.eup %1025  ;;  %v465_v27 = vpop.f32.mrf.mxu0 }
 0x154   : > { %v1028_v28 = vpop.eup %1027  ;;  %v466_v29 = vadd.f32 %v465_v27, %v312_v50  ;;  %v487_v30 = vpack.c.bf16 %v1026_v25, %v1022_v21  ;;  %1039 = vtanh.f32 %v464_v24 }
 0x155   : > { %v486_v31 = vpack.c.bf16 %v1024_v23, %v1028_v28 }
 0x156   : > { %1041 = vtanh.f32 %v466_v29  ;;  %667 = vmatprep.mubr.bf16.mxu1 %v487_v30 }
 0x157   : > { %1043 = vtanh.f32 %v460_v26  ;;  %668 = vmatmul.mubr.bf16.gmra.mxu1 %v486_v31  ;;  %v1030_v32 = vpop.eup %1029 }
 0x159   : > { %v1032_v33 = vpop.eup %1031 }
 0x15b   : > { %v1034_v34 = vpop.eup %1033 }
 0x15c   : > { %v1036_v35 = vpop.eup %1035  ;;  %v489_v36 = vpack.c.bf16 %v1034_v34, %v1030_v32 }
 0x15d   : > { %v488_v37 = vpack.c.bf16 %v1032_v33, %v1036_v35 }
 0x15e   : > { %675 = vmatprep.mubr.bf16.mxu1 %v489_v36 }
 0x15f   : > { %676 = vmatmul.mubr.bf16.gmra.mxu1 %v488_v37  ;;  %v1038_v38 = vpop.eup %1037 }
 0x161   : > { %v1040_v39 = vpop.eup %1039 }
 0x163   : > { %v1042_v40 = vpop.eup %1041 }
 0x164   : > { %v1044_v41 = vpop.eup %1043  ;;  %v491_v42 = vpack.c.bf16 %v1042_v40, %v1038_v38 }
 0x165   : > { %v490_v43 = vpack.c.bf16 %v1040_v39, %v1044_v41 }
 0x166   : > { %683 = vmatprep.mubr.bf16.mxu1 %v491_v42 }
 0x167   : > { %684 = vmatmul.mubr.bf16.gmra.mxu1 %v490_v43 }
 0x20f   : > { %v875_v44 = vpop.f32.mrf.mxu1 }
 0x211   : > { %v876_v46 = vpop.f32.mrf.mxu1 }
 0x212   : > { %v877_v47 = vadd.f32 %v876_v46, %v875_v44 }
 0x213   : > { %v878_v48 = vpop.f32.mrf.mxu1 }
 0x214   : > { %v662_v49 = vadd.f32 %v877_v47, %v835_v45 }
 0x215   : > { %v879_v50 = vpop.f32.mrf.mxu1 }
 0x216   : > { %692 = vst [vmem:[%s1400_s14] sm:$0xff] %v662_v49  ;;  %v880_v51 = vadd.f32 %v879_v50, %v878_v48 }
 0x217   : > { %v881_v52 = vpop.f32.mrf.mxu1 }
 0x218   : > { %v665_v53 = vadd.f32 %v880_v51, %v835_v45 }
 0x219   : > { %v882_v54 = vpop.f32.mrf.mxu1 }
 0x21a   : > { %693 = vst [vmem:[%s1400_s14 + $0x8] sm:$0xff] %v665_v53  ;;  %v883_v55 = vadd.f32 %v882_v54, %v881_v52 }
 0x21b   : > { %v884_v56 = vpop.f32.mrf.mxu1 }
 0x21c   : > { %v670_v57 = vadd.f32 %v883_v55, %v835_v45 }
 0x21d   : > { %v885_v58 = vpop.f32.mrf.mxu1 }
 0x21e   : > { %694 = vst [vmem:[%s1400_s14 + $0x10] sm:$0xff] %v670_v57  ;;  %v886_v59 = vadd.f32 %v885_v58, %v884_v56 }
 0x21f   : > { %v887_v60 = vpop.f32.mrf.mxu1 }
 0x220   : > { %v673_v61 = vadd.f32 %v886_v59, %v835_v45 }
 0x221   : > { %v888_v62 = vpop.f32.mrf.mxu1 }
 0x222   : > { %695 = vst [vmem:[%s1400_s14 + $0x18] sm:$0xff] %v673_v61  ;;  %v889_v63 = vadd.f32 %v888_v62, %v887_v60 }
 0x223   : > { %v890_v0 = vpop.f32.mrf.mxu1 }
 0x224   : > { %v678_v1 = vadd.f32 %v889_v63, %v835_v45 }
 0x225   : > { %v891_v2 = vpop.f32.mrf.mxu1 }
 0x226   : > { %696 = vst [vmem:[%s1400_s14 + $0x20] sm:$0xff] %v678_v1  ;;  %v892_v3 = vadd.f32 %v891_v2, %v890_v0 }
 0x227   : > { %v893_v4 = vpop.f32.mrf.mxu1 }
 0x228   : > { %v681_v5 = vadd.f32 %v892_v3, %v835_v45 }
 0x229   : > { %v894_v6 = vpop.f32.mrf.mxu1 }
 0x22a   : > { %697 = vst [vmem:[%s1400_s14 + $0x28] sm:$0xff] %v681_v5  ;;  %v895_v7 = vadd.f32 %v894_v6, %v893_v4 }
 0x22b   : > { %v896_v8 = vpop.f32.mrf.mxu1 }
 0x22c   : > { %v686_v9 = vadd.f32 %v895_v7, %v835_v45 }
 0x22d   : > { %v897_v10 = vpop.f32.mrf.mxu1 }
 0x22e   : > { %698 = vst [vmem:[%s1400_s14 + $0x30] sm:$0xff] %v686_v9  ;;  %v898_v11 = vadd.f32 %v897_v10, %v896_v8 }
 0x230   : > { %v689_v12 = vadd.f32 %v898_v11, %v835_v45 }
 0x232   : > { %699 = vst [vmem:[%s1400_s14 + $0x38] sm:$0xff] %v689_v12 }
 0x233   : > { %1138 = shalt.err (!%p1135_p5)
}
 0x234   : > { %s1139_s15 = scalar_lea.hbm %s1416_s13, 1024  ;;  %s1143_s9 = scalar_lea.hbm %s1464_s5, 8192 }
 0x235   : > { %p1140_p10 = scmp.ne.s32.totalorder %s1416_s13, %s1139_s15  ;;  %p1144_p4 = scmp.lt.s32.totalorder %s1416_s13, %s1464_s5 }
 0x236   : > { %p1145_p6 = scmp.lt.s32.totalorder %s1143_s9, %s1139_s15 }
 0x237   : > { %p1141_p9 = pnand %p1140_p10, %p1481_p2 }
 0x238   : > { %p1146_p8 = por %p1145_p6, %p1144_p4 }
 0x239   : > { %p1142_p1 = pneg %p1141_p9 }
 0x23b   : > { %p1147_p0 = pnand %p1146_p8, %p1142_p1 }
 0x23d   : > { %1150 = shalt.err (!%p1147_p0)
}
 0x23e   : > { %s1204_s10 = smov 128   ;;  %s1205_s11 = smov 8  }
 0x23f   : > { %909 = dma.vmem_to_hbm [thread:$0]  (%p1481_p2), %s1410_s16, 1024, %s1416_s13, %s701_s27, %s1204_s10, %s1204_s10, %s1205_s11  }
 0x240 PF: > { %p931_p7 = scmp.ge.s32.totalorder %s1193_s21, 2  ;;  %s729_s29 = sand.u32 1, %s1181_s18  }
 0x241   : > { %p1482_p11 = scmp.ne.s32.totalorder %s1471_s25, 0  ;;  %s730_s23 = scalar_lea.sflag [#allocation4], %s729_s29 }
 0x243   : > { %p923_p12 = pnand %p931_p7, %p1482_p11 }
 0x245   : > { %p924_p13 = pneg %p923_p12 }
 0x247   : > { %1176 = dma.done.wait (%p924_p13), %s730_s23, 1024  }
 0x248   : > { %1178 = vsyncadd (%p924_p13), %s730_s23, 4294966272  ;;  %p19_p3 = scmp.ge.s32.totalorder %s1310_s17, 10   ;;  %s1483_s18 = smov %s1185_s19 }
 0x249   : > { %s1484_s19 = smov %s1189_s20  ;;  %s1485_s20 = smov %s1319_s28 }
 0x24a   : > { %s1486_s21 = smov %s1310_s17  ;;  %21 = sbr.rel (!%p19_p3) target bundleno = 6 (0x6), region = 93 }
 0x24f   :  { %735 = vsyncpa [#allocation3], 1 }
 0x250   :  { %737 = vsyncpa [#allocation3 + $0x1], 1 }
 0x251   :  { %738 = vsyncpa [#allocation6], 1 }
 0x252   :  { %739 = vsyncpa [#allocation4], 1 }
 0x253   :  { %741 = vsyncpa [#allocation4 + $0x1], 1 }

</bundles_post_ra>
